<compile_context>
chip_gen: v6e
topology: v6e:2x2x1
jax: 0.10.0
libtpu: 0.0.40
codegen_flags: <defaults>
</compile_context>

<pallas_src>
import functools
import math

import jax
import jax.numpy as jnp
from jax import lax
from jax.experimental import pallas as pl
from jax.experimental.pallas import tpu as pltpu


def _round_up(n, m):
    return ((n + m - 1) // m) * m


def _arm_kinematics_kernel(x_ref, scales_ref, w1t_ref, b1_ref, w2t_ref, b2_ref,
                           w3t_ref, b3_ref, o_ref):
    """One batch tile of Linear->Tanh->Linear->Tanh->Linear->Sigmoid (+affine).

    x_ref      : (bt, dof)      native HBM layout, batch on sublanes
    w*t_ref    : transposed weights, hidden dim zero-padded to a sublane mult
    b*_ref     : bias columns (features, 1)
    scales_ref : SMEM (2,) = [out_lo, out_scale]; plain forward uses [0, 1]
    o_ref      : (bt, out_dim)  native output layout
    """
    f32 = jnp.float32
    x = x_ref[...]                                              # (bt, dof)

    # Layer 1: contract dof of BOTH operands -> (H_P, bt); batch moves onto
    # lanes so layers 2/3 are plain lane-dense N-dimension matmuls and all
    # tanh/sigmoid vregs are fully lane-packed.
    h1 = jnp.tanh(
        lax.dot_general(w1t_ref[...], x,
                        dimension_numbers=(((1,), (1,)), ((), ())),
                        preferred_element_type=f32)
        + b1_ref[...])                                          # (H_P, bt)
    h2 = jnp.tanh(
        jnp.dot(w2t_ref[...], h1, preferred_element_type=f32)
        + b2_ref[...])                                          # (H_P, bt)
    logits = (jnp.dot(w3t_ref[...], h2, preferred_element_type=f32)
              + b3_ref[...])                                    # (out_dim, bt)

    # sigmoid(z) = 0.5*(tanh(z/2)+1): stays on the EUP slot (no f32 divide),
    # fused with the (optional) output affine scale from scaled_forward.
    sig = 0.5 * (jnp.tanh(0.5 * logits) + 1.0)
    out = scales_ref[0] + scales_ref[1] * sig                   # (out_dim, bt)

    # Tiny in-kernel transpose (XLU is idle here) so the HBM output keeps the
    # native (B, out_dim) layout -> no wrapper-side transpose pass.
    o_ref[...] = out.T.astype(o_ref.dtype)


@functools.partial(jax.jit, static_argnames=("batch_tile",))
def _forward_impl(x, params, out_lo, out_scale, batch_tile):
    w1, b1, w2, b2, w3, b3 = (params["w1"], params["b1"], params["w2"],
                              params["b2"], params["w3"], params["b3"])
    B, dof = x.shape
    H = w1.shape[1]
    out_dim = w3.shape[1]
    f32 = jnp.float32

    # Hidden dim padded to a sublane multiple only inside the tiny resident
    # weight tiles; dof / out_dim stay unpadded in HBM so the batch-sized
    # streams are 12 B in + 8 B out per element.
    H_P = _round_up(H, 8)
    w1t = jnp.zeros((H_P, dof), f32).at[:H, :].set(w1.T.astype(f32))
    b1c = jnp.zeros((H_P, 1), f32).at[:H, :].set(b1.T.astype(f32))
    w2t = jnp.zeros((H_P, H_P), f32).at[:H, :H].set(w2.T.astype(f32))
    b2c = jnp.zeros((H_P, 1), f32).at[:H, :].set(b2.T.astype(f32))
    w3t = jnp.zeros((out_dim, H_P), f32).at[:, :H].set(w3.T.astype(f32))
    b3c = b3.T.astype(f32)                                      # (out_dim, 1)

    # Batch tiling: batch lives on sublanes of the I/O tiles, so the tile only
    # needs to be a multiple of 8.  Small batches -> a single exact block
    # (usually zero wrapper copies); large batches -> >=2 grid steps so the
    # "parallel" batch axis can use both v7x TensorCores.
    cap = max(128, _round_up(int(batch_tile), 128))
    if B <= 1024:
        bt = max(8, _round_up(B, 8))
    else:
        nsteps = max(2, pl.cdiv(B, cap))
        bt = _round_up(pl.cdiv(B, nsteps), 128)
    B_pad = _round_up(B, bt)
    grid = (B_pad // bt,)

    xb = x.astype(f32)
    if B_pad != B:
        xb = jnp.pad(xb, ((0, B_pad - B), (0, 0)))

    scales = jnp.stack([jnp.asarray(out_lo, f32).reshape(()),
                        jnp.asarray(out_scale, f32).reshape(())])

    def resident(shape):
        # Tiny weights/biases: full array resident in VMEM every grid step.
        return pl.BlockSpec(shape, lambda i: (0, 0))

    # VMEM note: the narrow-lane (bt, dof)/(bt, out_dim) tiles pad to 128
    # lanes in VMEM (~512 B per batch element per buffer, double-buffered), so
    # raise the scoped limit past v5e's 16 MiB default for large tiles.
    vmem_limit = int(min(64 << 20, max(32 << 20, 6 * bt * 512 + (2 << 20))))

    out_full = pl.pallas_call(
        _arm_kinematics_kernel,
        out_shape=jax.ShapeDtypeStruct((B_pad, out_dim), f32),
        grid_spec=pltpu.PrefetchScalarGridSpec(
            num_scalar_prefetch=0,
            grid=grid,
            in_specs=[
                pl.BlockSpec((bt, dof), lambda i: (i, 0)),          # x tile
                pl.BlockSpec(memory_space=pltpu.MemorySpace.SMEM),  # [lo, scale]
                resident((H_P, dof)),      # w1^T
                resident((H_P, 1)),        # b1
                resident((H_P, H_P)),      # w2^T
                resident((H_P, 1)),        # b2
                resident((out_dim, H_P)),  # w3^T
                resident((out_dim, 1)),    # b3
            ],
            out_specs=pl.BlockSpec((bt, out_dim), lambda i: (i, 0)),
        ),
        compiler_params=pltpu.CompilerParams(
            dimension_semantics=("parallel",),   # megacore-friendly on v7x
            vmem_limit_bytes=vmem_limit,
        ),
    )(xb, scales, w1t, b1c, w2t, b2c, w3t, b3c)

    return out_full if B_pad == B else out_full[:B]


def arm_kinematics_forward(x, params, *, batch_tile=8192):
    """Pallas forward pass of ArmKinematics.layers.

    x: (B, dof) float32.
    params: w1 (dof, H), b1 (1, H), w2 (H, H), b2 (1, H), w3 (H, out_dim),
            b3 (1, out_dim)  (weights stored (in, out), i.e. transposed
            relative to torch nn.Linear.weight).
    """
    return _forward_impl(x, params, 0.0, 1.0, batch_tile)


def init_params(key, dof=3, hidden_size=20, out_dim=2):
    """Deterministic init mirroring torch.nn.Linear (uniform +/- 1/sqrt(fan_in))."""
    ks = jax.random.split(key, 6)

    def lin(kw, kb, fan_in, fan_out):
        bound = 1.0 / math.sqrt(fan_in)
        w = jax.random.uniform(kw, (fan_in, fan_out), jnp.float32, -bound, bound)
        b = jax.random.uniform(kb, (1, fan_out), jnp.float32, -bound, bound)
        return w, b

    w1, b1 = lin(ks[0], ks[1], dof, hidden_size)
    w2, b2 = lin(ks[2], ks[3], hidden_size, hidden_size)
    w3, b3 = lin(ks[4], ks[5], hidden_size, out_dim)
    return {"w1": w1, "b1": b1, "w2": w2, "b2": b2, "w3": w3, "b3": b3}


def reference_forward(x, p):
    h1 = jnp.tanh(x @ p["w1"] + p["b1"])
    h2 = jnp.tanh(h1 @ p["w2"] + p["b2"])
    return jax.nn.sigmoid(h2 @ p["w3"] + p["b3"])


# --- dependent functions (module-level glue) ---
def normalize_data(data, bounds):
    return (data - bounds[0]) / (bounds[1] - bounds[0])


def scale_data(data, bounds):
    return bounds[0] + data * (bounds[1] - bounds[0])


def scaled_forward(x, params, in_range, out_range, *, batch_tile=8192):
    # NOTE: the torch module computes layers(X) on the *un-normalized* X
    # (normalize_data's result is unused) — reproduced faithfully here.
    _ = normalize_data(x, in_range)
    lo = jnp.asarray(out_range[0], jnp.float32)
    hi = jnp.asarray(out_range[1], jnp.float32)
    if lo.ndim == 0 and hi.ndim == 0:
        # Scalar bounds: output scaling fused into the kernel epilogue
        # (removes an extra HBM read+write pass over the output).
        return _forward_impl(x, params, lo, hi - lo, batch_tile)
    out = _forward_impl(x, params, 0.0, 1.0, batch_tile)
    return scale_data(out, out_range)


if __name__ == "__main__":
    key = jax.random.PRNGKey(0)
    k_param, k_x = jax.random.split(key)

    dof, hidden, out_dim = 3, 20, 2
    B = 16  # small demo batch; single exact (16, 3) block, no padding needed

    params = init_params(k_param, dof=dof, hidden_size=hidden, out_dim=out_dim)
    x = jax.random.uniform(k_x, (B, dof), jnp.float32, -3.14, 3.14)

    out = jax.block_until_ready(arm_kinematics_forward(x, params))
    ref = reference_forward(x, params)
    assert out.shape == (B, out_dim)
    assert jnp.allclose(out, ref, atol=1e-5, rtol=1e-5), (
        f"max abs err {jnp.max(jnp.abs(out - ref))}"
    )

    # scaled_forward path (fused affine epilogue)
    in_range = (jnp.float32(-3.14), jnp.float32(3.14))
    out_range = (jnp.float32(0.0), jnp.float32(2.0))
    scaled = jax.block_until_ready(scaled_forward(x, params, in_range, out_range))
    ref_scaled = scale_data(ref, out_range)
    assert scaled.shape == (B, out_dim)
    assert jnp.allclose(scaled, ref_scaled, atol=1e-5, rtol=1e-5)

    # exercise the multi-step grid + batch-padding path
    B2 = 2000
    x2 = jax.random.uniform(jax.random.PRNGKey(1), (B2, dof), jnp.float32,
                            -3.14, 3.14)
    out2 = jax.block_until_ready(arm_kinematics_forward(x2, params))
    ref2 = reference_forward(x2, params)
    assert out2.shape == (B2, out_dim)
    assert jnp.allclose(out2, ref2, atol=1e-5, rtol=1e-5), (
        f"max abs err {jnp.max(jnp.abs(out2 - ref2))}"
    )

    print("KERNEL_OK")
</pallas_src>

<mosaic_0001>
module attributes {stable_mosaic.version = 11 : i64} {
  func.func @_arm_kinematics_kernel(%arg0: i32, %arg1: memref<16x3xf32, #tpu.memory_space<vmem>>, %arg2: memref<2xf32, #tpu.memory_space<smem>>, %arg3: memref<24x3xf32, #tpu.memory_space<vmem>>, %arg4: memref<24x1xf32, #tpu.memory_space<vmem>>, %arg5: memref<24x24xf32, #tpu.memory_space<vmem>>, %arg6: memref<24x1xf32, #tpu.memory_space<vmem>>, %arg7: memref<2x24xf32, #tpu.memory_space<vmem>>, %arg8: memref<2x1xf32, #tpu.memory_space<vmem>>, %arg9: memref<16x2xf32, #tpu.memory_space<vmem>>) attributes {dimension_semantics = [#tpu.dimension_semantics<parallel>], iteration_bounds = array<i64: 1>, scalar_prefetch = 0 : i64, scratch_operands = 0 : i64, tpu.core_type = #tpu.core_type<tc>, window_params = [{transform_indices = @transform_0, window_bounds = array<i64: 16, 3>}, {transform_indices = @transform_1, window_bounds = array<i64: 2>}, {pipeline_mode = #tpu.pipeline_mode<synchronous>, transform_indices = @transform_2, window_bounds = array<i64: 24, 3>}, {pipeline_mode = #tpu.pipeline_mode<synchronous>, transform_indices = @transform_3, window_bounds = array<i64: 24, 1>}, {pipeline_mode = #tpu.pipeline_mode<synchronous>, transform_indices = @transform_4, window_bounds = array<i64: 24, 24>}, {pipeline_mode = #tpu.pipeline_mode<synchronous>, transform_indices = @transform_5, window_bounds = array<i64: 24, 1>}, {pipeline_mode = #tpu.pipeline_mode<synchronous>, transform_indices = @transform_6, window_bounds = array<i64: 2, 24>}, {pipeline_mode = #tpu.pipeline_mode<synchronous>, transform_indices = @transform_7, window_bounds = array<i64: 2, 1>}, {transform_indices = @transform_8, window_bounds = array<i64: 16, 2>}]} {
    %c0 = arith.constant 0 : index
    %c0_0 = arith.constant 0 : index
    %0 = vector.load %arg1[%c0, %c0_0] : memref<16x3xf32, #tpu.memory_space<vmem>>, vector<16x3xf32>
    %c0_1 = arith.constant 0 : index
    %c0_2 = arith.constant 0 : index
    %1 = vector.load %arg3[%c0_1, %c0_2] : memref<24x3xf32, #tpu.memory_space<vmem>>, vector<24x3xf32>
    %cst = arith.constant dense<0.000000e+00> : vector<24x16xf32>
    %2 = tpu.matmul %1, %0, %cst {dimension_numbers = #tpu.dot_dimension_numbers<[1], [1], [0], [0], [0, 0, 1, 0], [], []>} : vector<24x3xf32>, vector<16x3xf32>, vector<24x16xf32> -> vector<24x16xf32>
    %c0_3 = arith.constant 0 : index
    %c0_4 = arith.constant 0 : index
    %3 = vector.load %arg4[%c0_3, %c0_4] : memref<24x1xf32, #tpu.memory_space<vmem>>, vector<24x1xf32>
    %4 = vector.broadcast %3 : vector<24x1xf32> to vector<24x16xf32>
    %5 = arith.addf %2, %4 : vector<24x16xf32>
    %6 = math.tanh %5 : vector<24x16xf32>
    %c0_5 = arith.constant 0 : index
    %c0_6 = arith.constant 0 : index
    %7 = vector.load %arg5[%c0_5, %c0_6] : memref<24x24xf32, #tpu.memory_space<vmem>>, vector<24x24xf32>
    %cst_7 = arith.constant dense<0.000000e+00> : vector<24x16xf32>
    %8 = tpu.matmul %7, %6, %cst_7 {dimension_numbers = #tpu.dot_dimension_numbers<[1], [0], [0], [1], [0, 0, 1, 1], [], []>} : vector<24x24xf32>, vector<24x16xf32>, vector<24x16xf32> -> vector<24x16xf32>
    %c0_8 = arith.constant 0 : index
    %c0_9 = arith.constant 0 : index
    %9 = vector.load %arg6[%c0_8, %c0_9] : memref<24x1xf32, #tpu.memory_space<vmem>>, vector<24x1xf32>
    %10 = vector.broadcast %9 : vector<24x1xf32> to vector<24x16xf32>
    %11 = arith.addf %8, %10 : vector<24x16xf32>
    %12 = math.tanh %11 : vector<24x16xf32>
    %c0_10 = arith.constant 0 : index
    %c0_11 = arith.constant 0 : index
    %13 = vector.load %arg7[%c0_10, %c0_11] : memref<2x24xf32, #tpu.memory_space<vmem>>, vector<2x24xf32>
    %cst_12 = arith.constant dense<0.000000e+00> : vector<2x16xf32>
    %14 = tpu.matmul %13, %12, %cst_12 {dimension_numbers = #tpu.dot_dimension_numbers<[1], [0], [0], [1], [0, 0, 1, 1], [], []>} : vector<2x24xf32>, vector<24x16xf32>, vector<2x16xf32> -> vector<2x16xf32>
    %c0_13 = arith.constant 0 : index
    %c0_14 = arith.constant 0 : index
    %15 = vector.load %arg8[%c0_13, %c0_14] : memref<2x1xf32, #tpu.memory_space<vmem>>, vector<2x1xf32>
    %16 = vector.broadcast %15 : vector<2x1xf32> to vector<2x16xf32>
    %17 = arith.addf %14, %16 : vector<2x16xf32>
    %cst_15 = arith.constant 5.000000e-01 : f32
    %18 = vector.broadcast %cst_15 : f32 to vector<2x16xf32>
    %19 = arith.mulf %18, %17 : vector<2x16xf32>
    %20 = math.tanh %19 : vector<2x16xf32>
    %cst_16 = arith.constant 1.000000e+00 : f32
    %21 = vector.broadcast %cst_16 : f32 to vector<2x16xf32>
    %22 = arith.addf %20, %21 : vector<2x16xf32>
    %cst_17 = arith.constant 5.000000e-01 : f32
    %23 = vector.broadcast %cst_17 : f32 to vector<2x16xf32>
    %24 = arith.mulf %23, %22 : vector<2x16xf32>
    %c0_18 = arith.constant 0 : index
    %25 = memref.load %arg2[%c0_18] : memref<2xf32, #tpu.memory_space<smem>>
    %c1 = arith.constant 1 : index
    %26 = memref.load %arg2[%c1] : memref<2xf32, #tpu.memory_space<smem>>
    %27 = vector.broadcast %26 : f32 to vector<2x16xf32>
    %28 = arith.mulf %27, %24 : vector<2x16xf32>
    %29 = vector.broadcast %25 : f32 to vector<2x16xf32>
    %30 = arith.addf %29, %28 : vector<2x16xf32>
    %31 = tpu.transpose %30, [1, 0] : vector<2x16xf32> -> vector<16x2xf32>
    %c0_19 = arith.constant 0 : index
    %c0_20 = arith.constant 0 : index
    %32 = vector.load %arg9[%c0_19, %c0_20] : memref<16x2xf32, #tpu.memory_space<vmem>>, vector<16x2xf32>
    tpu.vector_store %arg9[%c0_19, %c0_20], %31 {strides = array<i32>} : memref<16x2xf32, #tpu.memory_space<vmem>>, vector<16x2xf32>,
    return
  }
  func.func @transform_0(%arg0: i32) -> (i32, i32) {
    %c0_i32 = arith.constant 0 : i32
    %c0_i32_0 = arith.constant 0 : i32
    return %arg0, %c0_i32 : i32, i32
  }
  func.func @transform_1(%arg0: i32) -> i32 {
    %c0_i32 = arith.constant 0 : i32
    %c0_i32_0 = arith.constant 0 : i32
    return %c0_i32 : i32
  }
  func.func @transform_2(%arg0: i32) -> (i32, i32) {
    %c0_i32 = arith.constant 0 : i32
    %c0_i32_0 = arith.constant 0 : i32
    %c0_i32_1 = arith.constant 0 : i32
    return %c0_i32, %c0_i32_0 : i32, i32
  }
  func.func @transform_3(%arg0: i32) -> (i32, i32) {
    %c0_i32 = arith.constant 0 : i32
    %c0_i32_0 = arith.constant 0 : i32
    %c0_i32_1 = arith.constant 0 : i32
    return %c0_i32, %c0_i32_0 : i32, i32
  }
  func.func @transform_4(%arg0: i32) -> (i32, i32) {
    %c0_i32 = arith.constant 0 : i32
    %c0_i32_0 = arith.constant 0 : i32
    %c0_i32_1 = arith.constant 0 : i32
    return %c0_i32, %c0_i32_0 : i32, i32
  }
  func.func @transform_5(%arg0: i32) -> (i32, i32) {
    %c0_i32 = arith.constant 0 : i32
    %c0_i32_0 = arith.constant 0 : i32
    %c0_i32_1 = arith.constant 0 : i32
    return %c0_i32, %c0_i32_0 : i32, i32
  }
  func.func @transform_6(%arg0: i32) -> (i32, i32) {
    %c0_i32 = arith.constant 0 : i32
    %c0_i32_0 = arith.constant 0 : i32
    %c0_i32_1 = arith.constant 0 : i32
    return %c0_i32, %c0_i32_0 : i32, i32
  }
  func.func @transform_7(%arg0: i32) -> (i32, i32) {
    %c0_i32 = arith.constant 0 : i32
    %c0_i32_0 = arith.constant 0 : i32
    %c0_i32_1 = arith.constant 0 : i32
    return %c0_i32, %c0_i32_0 : i32, i32
  }
  func.func @transform_8(%arg0: i32) -> (i32, i32) {
    %c0_i32 = arith.constant 0 : i32
    %c0_i32_0 = arith.constant 0 : i32
    return %arg0, %c0_i32 : i32, i32
  }
}

</mosaic_0001>

<bundles_post_ra>
// kernel: _forward_impl.1
= control target key start
LH: loop header
LB: loop body
LE: loop exit
PB: predicated region body
PF: predicated region fallthrough
CT: control target
= control target key end

     0   :  { %13 = vsyncpa [#allocation3], 0  ;;  %s641_s0 = inlined_call_operand.vmem [shape: f32[16,3], index: 0, kind: input, shape index: {}]   ;;  %s642_s1 = inlined_call_operand.vmem [shape: f32[2], index: 1, kind: input, shape index: {}]   ;;  %s643_s2 = inlined_call_operand.vmem [shape: f32[24,3], index: 2, kind: input, shape index: {}]   ;;  %s644_s3 = inlined_call_operand.vmem [shape: f32[24,1], index: 3, kind: input, shape index: {}]   ;;  %s645_s4 = inlined_call_operand.vmem [shape: f32[24,24], index: 4, kind: input, shape index: {}]   ;;  %s646_s5 = inlined_call_operand.vmem [shape: f32[24,1], index: 5, kind: input, shape index: {}]   ;;  %s647_s6 = inlined_call_operand.vmem [shape: f32[2,24], index: 6, kind: input, shape index: {}]   ;;  %s648_s7 = inlined_call_operand.vmem [shape: f32[2,1], index: 7, kind: input, shape index: {}]   ;;  %s649_s8 = inlined_call_operand.vmem [shape: f32[16,2], index: 8, kind: output, shape index: {}]  }
   0x1   :  { %s22_s29 = sshll.u32 %s642_s1, 4  ;;  %s23_s29 = int_to_ptr.vmem [resolvable:$true] %s22_s29 }
   0x2   :  { %s490_s30 = scalar_lea.vmem %s23_s29, 16  ;;  %p495_p1 = scmp.lt.s32.totalorder %s23_s29, %s23_s29 }
   0x3   :  { %p491_p0 = scmp.ne.s32.totalorder %s23_s29, %s490_s30  ;;  %p496_p2 = scmp.lt.s32.totalorder %s490_s30, %s490_s30 }
   0x5   :  { %p497_p3 = por %p496_p2, %p495_p1 }
   0x7   :  { %p498_p4 = pnand %p497_p3, %p491_p0 }
   0x9   :  { %501 = shalt.err (!%p498_p4)
}
   0xa   :  { %s504_s9 = smov [#allocation2]  }
   0xb   :  { %25 = dma.vmem_to_smem %s23_s29, 16, %s504_s9, [#allocation3]  }
   0xc   :  { %502 = dma.done.wait [#allocation3], 16  }
   0xd   :  { %503 = vsyncadd [#allocation3], 4294967280 }
   0xe   :  { %41 = sfence }
   0xf   :  { %v43_v0 = vld [vmem:[%s641_s0 + $0x8] sm:$0xff]  ;;  %vm65_vm0 = vcmask 23552   ;;  %v505_v1 = vmov 0.0   ;;  %vm506_vm1 = vmmov 0   ;;  %v49_v2 = vld [vmem:[%s644_s3 + $0x10] sm:$0xff]  ;;  %v507_v3 = vmov 0  }
  0x10   :  { %433 = vmatprep.subr.mxu0 %v505_v1  ;;  %437 = vmatprep.mubr.msk.f32.mxu0 %vm506_vm1, %v505_v1  ;;  %v47_v4 = vld [vmem:[%s644_s3] sm:$0xff]  ;;  %v48_v6 = vld [vmem:[%s644_s3 + $0x8] sm:$0xff]  ;;  %v169_v8 = vld [vmem:[%s646_s5 + $0x10] sm:$0xff]  ;;  %vm185_vm2 = vcmask 195584   ;;  %s417_s12 = sld [smem:[#allocation2 + $0x1]]  ;;  %vm400_vm3 = vcmask 15360  }
  0x11   :  { %434 = vmatpush3.xpose.msk.msra.mxu0 %vm65_vm0, %v43_v0  ;;  %474 = vset.pattern.permute.xlu0 %v507_v3  ;;  %v42_v5 = vld [vmem:[%s641_s0] sm:$0xff]  ;;  %v168_v9 = vld [vmem:[%s646_s5 + $0x8] sm:$0xff]  ;;  %v46_v13 = vld [vmem:[%s643_s2 + $0x10] sm:$0xff]  ;;  %s362_s13 = sld [smem:[#allocation2]] }
  0x12   :  { %435 = vmatprep.subr.mxu0 %v505_v1  ;;  %62 = vperm.xlu0 %474, %v49_v2   ;;  %v44_v7 = vld [vmem:[%s643_s2] sm:$0xff]  ;;  %v45_v10 = vld [vmem:[%s643_s2 + $0x8] sm:$0xff]  ;;  %v166_v31 = vld [vmem:[%s645_s4 + $0x10] sm:$0xff] }
  0x13   :  { %475 = vset.pattern.permute.xlu1 %v507_v3  ;;  %446 = vmatprep.subr.mxu1 %v505_v1  ;;  %v167_v11 = vld [vmem:[%s646_s5] sm:$0xff]  ;;  %v165_v30 = vld [vmem:[%s645_s4 + $0x8] sm:$0xff] }
  0x14   :  { %52 = vperm.xlu1 %475, %v47_v4   ;;  %452 = vmatprep.mubr.msk.f32.mxu1 %vm506_vm1, %v505_v1  ;;  %v279_v12 = vld [vmem:[%s648_s7] sm:$0x3] }
  0x15   :  { %436 = vmatpush3.xpose.msk.msra.mxu0 %vm65_vm0, %v42_v5  ;;  %v164_v28 = vld [vmem:[%s645_s4] sm:$0xff] }
  0x16   :  { %57 = vperm.xlu0 %474, %v48_v6   ;;  %v278_v46 = vld [vmem:[%s647_s6] sm:$0x3]  ;;  %v364_v55 = vstv %s417_s12 }
  0x17   :  { %v366_v57 = vstv %s362_s13 }
  0x18   :  { %438 = vmatmul.mubr.msk.f32.vlgmr.msra.gmra.mxu0 %vm65_vm0, %v44_v7  ;;  %182 = vperm.xlu1 %475, %v169_v8  }
  0x19   :  { %440 = vmatprep.mubr.msk.f32.mxu0 %vm506_vm1, %v505_v1 }
  0x1a   :  { %177 = vperm.xlu0 %474, %v168_v9  }
  0x1c   :  { %441 = vmatmul.mubr.msk.f32.gmra.mxu0 %vm65_vm0, %v45_v10  ;;  %172 = vperm.xlu1 %475, %v167_v11  }
  0x1d   :  { %443 = vmatprep.mubr.msk.f32.mxu0 %vm506_vm1, %v505_v1 }
  0x1e   :  { %282 = vperm.xlu0 %474, %v279_v12  }
  0x20   :  { %444 = vmatmul.mubr.msk.f32.gmra.mxu0 %vm65_vm0, %v46_v13 }
  0x8d   :  { %v63_v15 = vpop.permute.xlu0 %62 }
  0x8f   :  { %v53_v19 = vpop.permute.xlu1 %52 }
  0x91   :  { %v58_v20 = vpop.permute.xlu0 %57 }
  0x93   :  { %v183_v34 = vpop.permute.xlu1 %182 }
  0x95   :  { %v178_v37 = vpop.permute.xlu0 %177 }
  0x97   :  { %v173_v41 = vpop.permute.xlu1 %172 }
  0x99   :  { %v283_v48 = vpop.permute.xlu0 %282 }
  0xd8   :  { %v147_v14 = vpop.f32.mrf.mxu0 }
  0xd9   :  { %v148_v25 = vadd.f32 %v147_v14, %v53_v19 }
  0xda   :  { %v439_v16 = vpop.f32.mrf.mxu0 }
  0xdc   :  { %v152_v17 = vpop.f32.mrf.mxu0 }
  0xdd   :  { %v153_v22 = vadd.f32 %v152_v17, %v58_v20 }
  0xde   :  { %v442_v18 = vpop.f32.mrf.mxu0 }
  0xe0   :  { %v157_v21 = vpop.f32.mrf.mxu0 }
  0xe1   :  { %v158_v23 = vadd.f32 %v157_v21, %v63_v15 }
  0xe2   :  { %v445_v24 = vpop.f32.mrf.mxu0 }
  0xe3   :  { %476 = vtanh.f32 %v158_v23 }
  0xe4   :  { %478 = vtanh.f32 %v153_v22 }
  0xe5   :  { %480 = vtanh.f32 %v148_v25 }
  0xf0   :  { %v477_v26 = vpop.eup %476 }
  0xf1   :  { %447 = vmatpush3.msra.mxu1 %v477_v26  ;;  %v479_v27 = vpop.eup %478 }
  0xf2   :  { %448 = vmatprep.subr.mxu1 %v505_v1  ;;  %v481_v29 = vpop.eup %480 }
  0xf3   :  { %449 = vmatpush3.msra.mxu1 %v479_v27 }
  0xf4   :  { %450 = vmatprep.subr.mxu1 %v505_v1 }
  0xf5   :  { %451 = vmatpush3.msra.mxu1 %v481_v29 }
  0xf6   :  { %453 = vmatmul.mubr.msk.f32.vlgmr.msra.gmra.mxu1 %vm185_vm2, %v164_v28  ;;  %461 = vmatprep.subr.mxu1 %v505_v1 }
  0xf7   :  { %455 = vmatprep.mubr.msk.f32.mxu1 %vm506_vm1, %v505_v1 }
  0xfa   :  { %456 = vmatmul.mubr.msk.f32.gmra.mxu1 %vm185_vm2, %v165_v30 }
  0xfb   :  { %458 = vmatprep.mubr.msk.f32.mxu1 %vm506_vm1, %v505_v1 }
  0xfe   :  { %459 = vmatmul.mubr.msk.f32.gmra.mxu1 %vm185_vm2, %v166_v31 }
  0xff   :  { %467 = vmatprep.mubr.msk.f32.mxu1 %vm506_vm1, %v505_v1 }
 0x1b6   :  { %v261_v32 = vpop.f32.mrf.mxu1 }
 0x1b7   :  { %v262_v43 = vadd.f32 %v261_v32, %v173_v41 }
 0x1b8   :  { %v454_v33 = vpop.f32.mrf.mxu1 }
 0x1ba   :  { %v266_v35 = vpop.f32.mrf.mxu1 }
 0x1bb   :  { %v267_v39 = vadd.f32 %v266_v35, %v178_v37 }
 0x1bc   :  { %v457_v36 = vpop.f32.mrf.mxu1 }
 0x1be   :  { %v271_v38 = vpop.f32.mrf.mxu1 }
 0x1bf   :  { %v272_v40 = vadd.f32 %v271_v38, %v183_v34 }
 0x1c0   :  { %v460_v42 = vpop.f32.mrf.mxu1 }
 0x1c1   :  { %482 = vtanh.f32 %v272_v40 }
 0x1c2   :  { %484 = vtanh.f32 %v267_v39 }
 0x1c3   :  { %486 = vtanh.f32 %v262_v43 }
 0x1ce   :  { %v483_v44 = vpop.eup %482 }
 0x1cf   :  { %462 = vmatpush3.msra.mxu1 %v483_v44  ;;  %v485_v45 = vpop.eup %484 }
 0x1d0   :  { %463 = vmatprep.subr.mxu1 %v505_v1  ;;  %v487_v47 = vpop.eup %486 }
 0x1d1   :  { %464 = vmatpush3.msra.mxu1 %v485_v45 }
 0x1d2   :  { %465 = vmatprep.subr.mxu1 %v505_v1 }
 0x1d3   :  { %466 = vmatpush3.msra.mxu1 %v487_v47 }
 0x1d4   :  { %468 = vmatmul.mubr.msk.f32.vlgmr.msra.gmra.mxu1 %vm185_vm2, %v278_v46 }
 0x294   :  { %v354_v49 = vpop.f32.mrf.mxu1 }
 0x295   :  { %v355_v50 = vadd.f32 %v354_v49, %v283_v48 }
 0x296   :  { %v469_v51 = vpop.f32.mrf.mxu1 }
 0x297   :  { %v358_v52 = vmul.f32 0.5, %v355_v50 }
 0x299   :  { %488 = vtanh.f32 %v358_v52 }
 0x2a6   :  { %v489_v53 = vpop.eup %488 }
 0x2a7   :  { %v360_v54 = vadd.f32 1.0, %v489_v53 }
 0x2a9   :  { %v361_v56 = vmul.f32 0.5, %v360_v54 }
 0x2ab   :  { %v365_v58 = vmul.f32 %v364_v55, %v361_v56 }
 0x2ad   :  { %v367_v59 = vadd.f32 %v366_v57, %v365_v58 }
 0x2af   :  { %368 = vxpose.xlu1.b32.start.end [1/1] (short) (narrow) %v367_v59, 16 }
 0x32b   :  { %v384_v60 = vpop.trf.xlu1 }
 0x32c   :  { %401 = vst.msk [vmem:[%s649_s8] sm:$0xff] %vm400_vm3, %v384_v60 }
 0x32f   :  { %v385_v61 = vpop.trf.xlu1 }
 0x330   :  { %402 = vst.msk [vmem:[%s649_s8 + $0x8] sm:$0xff] %vm400_vm3, %v385_v61 }
 0x331   :  { %407 = vsyncpa [#allocation3], 1 }

</bundles_post_ra>
